<compile_context>
chip_gen: v6e
topology: v6e:2x2x1
jax: 0.10.0
libtpu: 0.0.40
codegen_flags: <defaults>
</compile_context>

<pallas_src>
import functools

import jax
import jax.numpy as jnp
from jax import lax
from jax.experimental import pallas as pl
from jax.experimental.pallas import tpu as pltpu


def _conv_stats_kernel(x_ref, t_ref, conv_ref, stats_ref):
    """Pass 1: conv as KH lane-dense MXU matmuls + per-image partial BN stats.

    x_ref:     (1, Hp, W*Cin)        bf16  H-padded input, (W, Cin) fused on lanes
    t_ref:     (KH, W*Cin, Wo*Cout)  bf16  block-Toeplitz weights (W-pad folded in)
    conv_ref:  (1, Ho, Wo*Cout)      f32   conv output, lane-dense
    stats_ref: (1, 2, Wo*Cout)       f32   [sum over Ho ; sum of squares over Ho]
    """
    KH = t_ref.shape[0]
    Ho = conv_ref.shape[1]
    wo_cout = conv_ref.shape[2]

    x = x_ref[0]                                        # (Hp, W*Cin) bf16
    acc = jnp.zeros((Ho, wo_cout), jnp.float32)
    for ky in range(KH):                                # static unroll: KH matmuls
        acc += jnp.dot(x[ky:ky + Ho, :], t_ref[ky],
                       preferred_element_type=jnp.float32)

    conv_ref[0] = acc
    s = jnp.sum(acc, axis=0, keepdims=True)             # (1, Wo*Cout)
    ss = jnp.sum(acc * acc, axis=0, keepdims=True)      # (1, Wo*Cout)
    stats_ref[0] = jnp.concatenate([s, ss], axis=0)     # (2, Wo*Cout)


def _bn_lrelu_kernel(conv_ref, scale_ref, shift_ref, o_ref):
    """Pass 2: y = conv * scale + shift, then LeakyReLU(0.01). Lane-dense store."""
    y = conv_ref[0] * scale_ref[...] + shift_ref[...]   # (Ho, Wo*Cout)
    o_ref[0] = jnp.where(y >= 0, y, 0.01 * y).astype(o_ref.dtype)


def conv_block_2d(x_nchw, w_oihw, gamma, beta, *, padding=1, stride=1,
                  eps=1e-5, compute_dtype=jnp.bfloat16):
    """Forward pass of ConvBlock2D.  x_nchw: (N, Cin, H, W) like PyTorch."""
    assert stride == 1, "this kernel implements the default stride=1 case"
    N, Cin, H, W = x_nchw.shape
    Cout, Cin_w, KH, KW = w_oihw.shape
    assert Cin == Cin_w

    Ho = H + 2 * padding - KH + 1
    Wo = W + 2 * padding - KW + 1
    Hp = H + 2 * padding
    k_dim = W * Cin
    n_dim = Wo * Cout

    # ---- wrapper layout plumbing (O(input) bytes) --------------------------
    # NCHW -> NHWC, zero-pad H only (W padding is folded into the Toeplitz
    # weights below), fuse (W, Cin) into the lane dimension, cast to bf16.
    x = jnp.transpose(x_nchw, (0, 2, 3, 1))                          # (N,H,W,Cin)
    x = jnp.pad(x, ((0, 0), (padding, padding), (0, 0), (0, 0)))     # (N,Hp,W,Cin)
    x = x.reshape(N, Hp, k_dim).astype(compute_dtype)

    # Block-Toeplitz weight:
    #   T[ky, wi*Cin+ci, wo*Cout+co] = w[co, ci, ky, wi-wo+padding]
    #   when 0 <= wi-wo+padding < KW, else 0 (implicit W zero-padding).
    w_hwio = jnp.transpose(w_oihw, (2, 3, 1, 0)).astype(jnp.float32)  # (KH,KW,Cin,Cout)
    wi = jnp.arange(W)[:, None, None]
    wo = jnp.arange(Wo)[None, :, None]
    kx = jnp.arange(KW)[None, None, :]
    sel = (wi == wo + kx - padding).astype(jnp.float32)               # (W, Wo, KW)
    t = jnp.einsum('pok,ykcd->ypcod', sel, w_hwio)                    # (KH,W,Cin,Wo,Cout)
    t = t.reshape(KH, k_dim, n_dim).astype(compute_dtype)

    # ---- pass 1: conv + partial BN stats, grid over images (parallel) ------
    conv_out, stats = pl.pallas_call(
        _conv_stats_kernel,
        out_shape=(jax.ShapeDtypeStruct((N, Ho, n_dim), jnp.float32),
                   jax.ShapeDtypeStruct((N, 2, n_dim), jnp.float32)),
        grid_spec=pltpu.PrefetchScalarGridSpec(
            num_scalar_prefetch=0,
            grid=(N,),
            in_specs=[
                pl.BlockSpec((1, Hp, k_dim), lambda n: (n, 0, 0)),
                pl.BlockSpec((KH, k_dim, n_dim), lambda n: (0, 0, 0)),
            ],
            out_specs=[
                pl.BlockSpec((1, Ho, n_dim), lambda n: (n, 0, 0)),
                pl.BlockSpec((1, 2, n_dim), lambda n: (n, 0, 0)),
            ]),
        compiler_params=pltpu.CompilerParams(
            dimension_semantics=("parallel",)),
    )(x, t)

    # ---- pass boundary: finish BN statistics (tiny, per-channel, f32) ------
    m = float(N * Ho * Wo)
    s = jnp.sum(stats[:, 0, :].reshape(N, Wo, Cout), axis=(0, 1))     # (Cout,)
    ss = jnp.sum(stats[:, 1, :].reshape(N, Wo, Cout), axis=(0, 1))    # (Cout,)
    mean = s / m
    var = jnp.maximum(ss / m - mean * mean, 0.0)                      # biased variance
    scale = gamma.astype(jnp.float32) * lax.rsqrt(var + eps)          # (Cout,)
    shift = beta.astype(jnp.float32) - mean * scale                   # (Cout,)
    scale_row = jnp.tile(scale, Wo).reshape(1, n_dim)                 # lane = wo*Cout+co
    shift_row = jnp.tile(shift, Wo).reshape(1, n_dim)

    # ---- pass 2: normalize + LeakyReLU, lane-dense stores -------------------
    y = pl.pallas_call(
        _bn_lrelu_kernel,
        out_shape=jax.ShapeDtypeStruct((N, Ho, n_dim), x_nchw.dtype),
        grid_spec=pltpu.PrefetchScalarGridSpec(
            num_scalar_prefetch=0,
            grid=(N,),
            in_specs=[
                pl.BlockSpec((1, Ho, n_dim), lambda n: (n, 0, 0)),
                pl.BlockSpec((1, n_dim), lambda n: (0, 0)),
                pl.BlockSpec((1, n_dim), lambda n: (0, 0)),
            ],
            out_specs=pl.BlockSpec((1, Ho, n_dim), lambda n: (n, 0, 0))),
        compiler_params=pltpu.CompilerParams(
            dimension_semantics=("parallel",)),
    )(conv_out, scale_row, shift_row)

    # (N, Ho, Wo*Cout) -> NCHW
    return jnp.transpose(y.reshape(N, Ho, Wo, Cout), (0, 3, 1, 2))


def _reference(x_nchw, w_oihw, gamma, beta, *, padding=1):
    """Pure-JAX f32 reference for correctness check."""
    conv = lax.conv_general_dilated(
        x_nchw.astype(jnp.float32), w_oihw.astype(jnp.float32),
        window_strides=(1, 1),
        padding=((padding, padding), (padding, padding)),
        dimension_numbers=("NCHW", "OIHW", "NCHW"))
    mean = jnp.mean(conv, axis=(0, 2, 3), keepdims=True)
    var = jnp.mean((conv - mean) ** 2, axis=(0, 2, 3), keepdims=True)
    xhat = (conv - mean) * lax.rsqrt(var + 1e-5)
    y = xhat * gamma.reshape(1, -1, 1, 1) + beta.reshape(1, -1, 1, 1)
    return jnp.where(y >= 0, y, 0.01 * y)


if __name__ == "__main__":
    # Small shapes consistent with ConvBlock2D(input_channels=4, output_channels=8).
    N, Cin, H, W = 2, 4, 16, 16
    Cout, KH, KW = 8, 3, 3

    key = jax.random.PRNGKey(0)
    k_x, k_w, k_g, k_b = jax.random.split(key, 4)

    x = jax.random.normal(k_x, (N, Cin, H, W), dtype=jnp.float32)
    # Deterministic synthetic parameters (not a checkpoint load).
    w = 0.1 * jax.random.normal(k_w, (Cout, Cin, KH, KW), dtype=jnp.float32)
    gamma = 1.0 + 0.1 * jax.random.normal(k_g, (Cout,), dtype=jnp.float32)
    beta = 0.05 * jax.random.normal(k_b, (Cout,), dtype=jnp.float32)

    fwd = jax.jit(functools.partial(conv_block_2d, padding=1, stride=1))
    out = jax.block_until_ready(fwd(x, w, gamma, beta))

    ref = _reference(x, w, gamma, beta, padding=1)
    assert out.shape == (N, Cout, H, W)
    # bf16 MXU inputs (f32 accumulation / f32 BN) vs. f32 reference:
    # relaxed tolerance covers bf16 rounding (~1e-2), still catches indexing bugs.
    assert jnp.allclose(out, ref, atol=2e-2, rtol=2e-2), "mismatch vs reference"

    print("KERNEL_OK")
</pallas_src>

<mosaic_0001>
module attributes {stable_mosaic.version = 11 : i64} {
  func.func @_conv_stats_kernel(%arg0: i32, %arg1: memref<1x18x64xbf16, #tpu.memory_space<vmem>>, %arg2: memref<3x64x128xbf16, #tpu.memory_space<vmem>>, %arg3: memref<1x16x128xf32, #tpu.memory_space<vmem>>, %arg4: memref<1x2x128xf32, #tpu.memory_space<vmem>>) attributes {dimension_semantics = [#tpu.dimension_semantics<parallel>], iteration_bounds = array<i64: 2>, scalar_prefetch = 0 : i64, scratch_operands = 0 : i64, tpu.core_type = #tpu.core_type<tc>, window_params = [{transform_indices = @transform_0, window_bounds = array<i64: 1, 18, 64>}, {pipeline_mode = #tpu.pipeline_mode<synchronous>, transform_indices = @transform_1, window_bounds = array<i64: 3, 64, 128>}, {transform_indices = @transform_2, window_bounds = array<i64: 1, 16, 128>}, {transform_indices = @transform_3, window_bounds = array<i64: 1, 2, 128>}]} {
    %c0 = arith.constant 0 : index
    %c0_0 = arith.constant 0 : index
    %c0_1 = arith.constant 0 : index
    %0 = vector.load %arg1[%c0, %c0_0, %c0_1] : memref<1x18x64xbf16, #tpu.memory_space<vmem>>, vector<1x18x64xbf16>
    %1 = vector.shape_cast %0 : vector<1x18x64xbf16> to vector<18x64xbf16>
    %cst = arith.constant 0.000000e+00 : f32
    %2 = vector.broadcast %cst : f32 to vector<16x128xf32>
    %3 = vector.extract_strided_slice %1 {offsets = [0, 0], sizes = [16, 64], strides = [1, 1]} : vector<18x64xbf16> to vector<16x64xbf16>
    %c0_2 = arith.constant 0 : index
    %c0_3 = arith.constant 0 : index
    %c0_4 = arith.constant 0 : index
    %4 = vector.load %arg2[%c0_2, %c0_3, %c0_4] : memref<3x64x128xbf16, #tpu.memory_space<vmem>>, vector<1x64x128xbf16>
    %5 = vector.shape_cast %4 : vector<1x64x128xbf16> to vector<64x128xbf16>
    %cst_5 = arith.constant dense<0.000000e+00> : vector<16x128xf32>
    %6 = tpu.matmul %3, %5, %cst_5 {dimension_numbers = #tpu.dot_dimension_numbers<[1], [0], [0], [1], [0, 0, 1, 1], [], []>} : vector<16x64xbf16>, vector<64x128xbf16>, vector<16x128xf32> -> vector<16x128xf32>
    %7 = arith.addf %2, %6 : vector<16x128xf32>
    %8 = vector.extract_strided_slice %1 {offsets = [1, 0], sizes = [16, 64], strides = [1, 1]} : vector<18x64xbf16> to vector<16x64xbf16>
    %c1 = arith.constant 1 : index
    %c0_6 = arith.constant 0 : index
    %c0_7 = arith.constant 0 : index
    %9 = vector.load %arg2[%c1, %c0_6, %c0_7] : memref<3x64x128xbf16, #tpu.memory_space<vmem>>, vector<1x64x128xbf16>
    %10 = vector.shape_cast %9 : vector<1x64x128xbf16> to vector<64x128xbf16>
    %cst_8 = arith.constant dense<0.000000e+00> : vector<16x128xf32>
    %11 = tpu.matmul %8, %10, %cst_8 {dimension_numbers = #tpu.dot_dimension_numbers<[1], [0], [0], [1], [0, 0, 1, 1], [], []>} : vector<16x64xbf16>, vector<64x128xbf16>, vector<16x128xf32> -> vector<16x128xf32>
    %12 = arith.addf %7, %11 : vector<16x128xf32>
    %13 = vector.extract_strided_slice %1 {offsets = [2, 0], sizes = [16, 64], strides = [1, 1]} : vector<18x64xbf16> to vector<16x64xbf16>
    %c2 = arith.constant 2 : index
    %c0_9 = arith.constant 0 : index
    %c0_10 = arith.constant 0 : index
    %14 = vector.load %arg2[%c2, %c0_9, %c0_10] : memref<3x64x128xbf16, #tpu.memory_space<vmem>>, vector<1x64x128xbf16>
    %15 = vector.shape_cast %14 : vector<1x64x128xbf16> to vector<64x128xbf16>
    %cst_11 = arith.constant dense<0.000000e+00> : vector<16x128xf32>
    %16 = tpu.matmul %13, %15, %cst_11 {dimension_numbers = #tpu.dot_dimension_numbers<[1], [0], [0], [1], [0, 0, 1, 1], [], []>} : vector<16x64xbf16>, vector<64x128xbf16>, vector<16x128xf32> -> vector<16x128xf32>
    %17 = arith.addf %12, %16 : vector<16x128xf32>
    %c0_12 = arith.constant 0 : index
    %c0_13 = arith.constant 0 : index
    %c0_14 = arith.constant 0 : index
    %18 = vector.load %arg3[%c0_12, %c0_13, %c0_14] : memref<1x16x128xf32, #tpu.memory_space<vmem>>, vector<1x16x128xf32>
    %19 = vector.shape_cast %18 : vector<1x16x128xf32> to vector<16x128xf32>
    %20 = vector.shape_cast %17 : vector<16x128xf32> to vector<1x16x128xf32>
    tpu.vector_store %arg3[%c0_12, %c0_13, %c0_14], %20 {strides = array<i32>} : memref<1x16x128xf32, #tpu.memory_space<vmem>>, vector<1x16x128xf32>,
    %cst_15 = arith.constant dense<0.000000e+00> : vector<128xf32>
    %21 = vector.multi_reduction <add>, %17, %cst_15 [0] : vector<16x128xf32> to vector<128xf32>
    %22 = vector.shape_cast %21 : vector<128xf32> to vector<1x128xf32>
    %23 = arith.mulf %17, %17 : vector<16x128xf32>
    %cst_16 = arith.constant dense<0.000000e+00> : vector<128xf32>
    %24 = vector.multi_reduction <add>, %23, %cst_16 [0] : vector<16x128xf32> to vector<128xf32>
    %25 = vector.shape_cast %24 : vector<128xf32> to vector<1x128xf32>
    %26 = tpu.concatenate %22, %25 in 0 : vector<1x128xf32>, vector<1x128xf32> -> vector<2x128xf32>
    %c0_17 = arith.constant 0 : index
    %c0_18 = arith.constant 0 : index
    %c0_19 = arith.constant 0 : index
    %27 = vector.load %arg4[%c0_17, %c0_18, %c0_19] : memref<1x2x128xf32, #tpu.memory_space<vmem>>, vector<1x2x128xf32>
    %28 = vector.shape_cast %27 : vector<1x2x128xf32> to vector<2x128xf32>
    %29 = vector.shape_cast %26 : vector<2x128xf32> to vector<1x2x128xf32>
    tpu.vector_store %arg4[%c0_17, %c0_18, %c0_19], %29 {strides = array<i32>} : memref<1x2x128xf32, #tpu.memory_space<vmem>>, vector<1x2x128xf32>,
    return
  }
  func.func @transform_0(%arg0: i32) -> (i32, i32, i32) {
    %c0_i32 = arith.constant 0 : i32
    %c0_i32_0 = arith.constant 0 : i32
    %c0_i32_1 = arith.constant 0 : i32
    return %arg0, %c0_i32, %c0_i32_0 : i32, i32, i32
  }
  func.func @transform_1(%arg0: i32) -> (i32, i32, i32) {
    %c0_i32 = arith.constant 0 : i32
    %c0_i32_0 = arith.constant 0 : i32
    %c0_i32_1 = arith.constant 0 : i32
    %c0_i32_2 = arith.constant 0 : i32
    return %c0_i32, %c0_i32_0, %c0_i32_1 : i32, i32, i32
  }
  func.func @transform_2(%arg0: i32) -> (i32, i32, i32) {
    %c0_i32 = arith.constant 0 : i32
    %c0_i32_0 = arith.constant 0 : i32
    %c0_i32_1 = arith.constant 0 : i32
    return %arg0, %c0_i32, %c0_i32_0 : i32, i32, i32
  }
  func.func @transform_3(%arg0: i32) -> (i32, i32, i32) {
    %c0_i32 = arith.constant 0 : i32
    %c0_i32_0 = arith.constant 0 : i32
    %c0_i32_1 = arith.constant 0 : i32
    return %arg0, %c0_i32, %c0_i32_0 : i32, i32, i32
  }
}

module attributes {stable_mosaic.version = 11 : i64} {
  func.func @_bn_lrelu_kernel(%arg0: i32, %arg1: memref<1x16x128xf32, #tpu.memory_space<vmem>>, %arg2: memref<1x128xf32, #tpu.memory_space<vmem>>, %arg3: memref<1x128xf32, #tpu.memory_space<vmem>>, %arg4: memref<1x16x128xf32, #tpu.memory_space<vmem>>) attributes {dimension_semantics = [#tpu.dimension_semantics<parallel>], iteration_bounds = array<i64: 2>, scalar_prefetch = 0 : i64, scratch_operands = 0 : i64, tpu.core_type = #tpu.core_type<tc>, window_params = [{transform_indices = @transform_0, window_bounds = array<i64: 1, 16, 128>}, {pipeline_mode = #tpu.pipeline_mode<synchronous>, transform_indices = @transform_1, window_bounds = array<i64: 1, 128>}, {pipeline_mode = #tpu.pipeline_mode<synchronous>, transform_indices = @transform_2, window_bounds = array<i64: 1, 128>}, {transform_indices = @transform_3, window_bounds = array<i64: 1, 16, 128>}]} {
    %c0 = arith.constant 0 : index
    %c0_0 = arith.constant 0 : index
    %c0_1 = arith.constant 0 : index
    %0 = vector.load %arg1[%c0, %c0_0, %c0_1] : memref<1x16x128xf32, #tpu.memory_space<vmem>>, vector<1x16x128xf32>
    %1 = vector.shape_cast %0 : vector<1x16x128xf32> to vector<16x128xf32>
    %c0_2 = arith.constant 0 : index
    %c0_3 = arith.constant 0 : index
    %2 = vector.load %arg2[%c0_2, %c0_3] : memref<1x128xf32, #tpu.memory_space<vmem>>, vector<1x128xf32>
    %3 = vector.broadcast %2 : vector<1x128xf32> to vector<16x128xf32>
    %4 = arith.mulf %1, %3 : vector<16x128xf32>
    %c0_4 = arith.constant 0 : index
    %c0_5 = arith.constant 0 : index
    %5 = vector.load %arg3[%c0_4, %c0_5] : memref<1x128xf32, #tpu.memory_space<vmem>>, vector<1x128xf32>
    %6 = vector.broadcast %5 : vector<1x128xf32> to vector<16x128xf32>
    %7 = arith.addf %4, %6 : vector<16x128xf32>
    %cst = arith.constant 0.000000e+00 : f32
    %8 = vector.broadcast %cst : f32 to vector<16x128xf32>
    %9 = arith.cmpf oge, %7, %8 : vector<16x128xf32>
    %cst_6 = arith.constant 0.00999999977 : f32
    %10 = vector.broadcast %cst_6 : f32 to vector<16x128xf32>
    %11 = arith.mulf %10, %7 : vector<16x128xf32>
    %12 = arith.select %9, %7, %11 : vector<16x128xi1>, vector<16x128xf32>
    %c0_7 = arith.constant 0 : index
    %c0_8 = arith.constant 0 : index
    %c0_9 = arith.constant 0 : index
    %13 = vector.load %arg4[%c0_7, %c0_8, %c0_9] : memref<1x16x128xf32, #tpu.memory_space<vmem>>, vector<1x16x128xf32>
    %14 = vector.shape_cast %13 : vector<1x16x128xf32> to vector<16x128xf32>
    %15 = vector.shape_cast %12 : vector<16x128xf32> to vector<1x16x128xf32>
    tpu.vector_store %arg4[%c0_7, %c0_8, %c0_9], %15 {strides = array<i32>} : memref<1x16x128xf32, #tpu.memory_space<vmem>>, vector<1x16x128xf32>,
    return
  }
  func.func @transform_0(%arg0: i32) -> (i32, i32, i32) {
    %c0_i32 = arith.constant 0 : i32
    %c0_i32_0 = arith.constant 0 : i32
    %c0_i32_1 = arith.constant 0 : i32
    return %arg0, %c0_i32, %c0_i32_0 : i32, i32, i32
  }
  func.func @transform_1(%arg0: i32) -> (i32, i32) {
    %c0_i32 = arith.constant 0 : i32
    %c0_i32_0 = arith.constant 0 : i32
    %c0_i32_1 = arith.constant 0 : i32
    return %c0_i32, %c0_i32_0 : i32, i32
  }
  func.func @transform_2(%arg0: i32) -> (i32, i32) {
    %c0_i32 = arith.constant 0 : i32
    %c0_i32_0 = arith.constant 0 : i32
    %c0_i32_1 = arith.constant 0 : i32
    return %c0_i32, %c0_i32_0 : i32, i32
  }
  func.func @transform_3(%arg0: i32) -> (i32, i32, i32) {
    %c0_i32 = arith.constant 0 : i32
    %c0_i32_0 = arith.constant 0 : i32
    %c0_i32_1 = arith.constant 0 : i32
    return %arg0, %c0_i32, %c0_i32_0 : i32, i32, i32
  }
}

</mosaic_0001>

<bundles_post_ra>
// kernel: tile.13
= control target key start
LH: loop header
LB: loop body
LE: loop exit
PB: predicated region body
PF: predicated region fallthrough
CT: control target
= control target key end

     0   :  { %s28_s0 = inlined_call_operand.vmem [shape: f32[8], index: 0, kind: input, shape index: {}]   ;;  %s29_s1 = inlined_call_operand.vmem [shape: f32[16,8], index: 1, kind: output, shape index: {}]  }
   0x1   :  { %v4_v0 = vld [vmem:[%s28_s0] ss:$0 sm:$0xff] }
   0x2   :  { %5 = vst [vmem:[%s29_s1] sm:$0xff] %v4_v0  ;;  %8 = vst [vmem:[%s29_s1 + $0x8] sm:$0xff] %v4_v0 }

// kernel: tile.14
= control target key start
LH: loop header
LB: loop body
LE: loop exit
PB: predicated region body
PF: predicated region fallthrough
CT: control target
= control target key end

     0   :  { %s133_s10 = smov 120   ;;  %s134_s11 = smov 104   ;;  %vm3_vm0 = vcmask 64512   ;;  %vm9_vm1 = vcmask 1048512   ;;  %vm15_vm2 = vcmask 982912   ;;  %vm21_vm3 = vcmask 917312   ;;  %s209_s0 = inlined_call_operand.vmem [shape: f32[16,8], index: 0, kind: input, shape index: {}]   ;;  %s210_s1 = inlined_call_operand.vmem [shape: f32[1,128], index: 1, kind: output, shape index: {}]  }
   0x1   :  { %v103_v0 = vld [vmem:[%s209_s0 + $0xf] sm:$0x1]   ;;  %v105_v1 = vld [vmem:[%s209_s0 + $0xd] sm:$0x1]   ;;  %v104_v2 = vld [vmem:[%s209_s0 + $0xe] sm:$0x1]  }
   0x2   :  { %7 = vrot.lane.b32.xlu0 %v103_v0, %s133_s10  ;;  %19 = vrot.lane.b32.xlu1 %v105_v1, %s134_s11  ;;  %v106_v3 = vld [vmem:[%s209_s0 + $0xc] sm:$0x1]   ;;  %s135_s16 = smov 112   ;;  %s136_s17 = smov 96   ;;  %v107_v4 = vld [vmem:[%s209_s0 + $0xb] sm:$0x1]  }
   0x3   :  { %v108_v5 = vld [vmem:[%s209_s0 + $0xa] sm:$0x1]   ;;  %v2_v6 = vld [vmem:[%s209_s0] sm:$0x1]   ;;  %s137_s24 = smov 88   ;;  %s138_s25 = smov 80  }
   0x4   :  { %4 = vst.msk [vmem:[#allocation0] sm:$0x1] %vm3_vm0, %v2_v6   ;;  %v109_v7 = vld [vmem:[%s209_s0 + $0x9] sm:$0x1]   ;;  %v110_v8 = vld [vmem:[%s209_s0 + $0x8] sm:$0x1]  }
   0x5   :  { %s139_s30 = smov 72   ;;  %s140_s2 = smov 64   ;;  %v111_v9 = vld [vmem:[%s209_s0 + $0x7] sm:$0x1]   ;;  %v112_v10 = vld [vmem:[%s209_s0 + $0x6] sm:$0x1]  }
   0x6   :  { %13 = vrot.lane.b32.xlu0 %v104_v2, %s135_s16  ;;  %25 = vrot.lane.b32.xlu1 %v106_v3, %s136_s17  ;;  %s141_s7 = smov 56   ;;  %s142_s8 = smov 48   ;;  %v113_v11 = vld [vmem:[%s209_s0 + $0x5] sm:$0x1]   ;;  %v114_v12 = vld [vmem:[%s209_s0 + $0x4] sm:$0x1]  }
   0x7   :  { %s143_s13 = smov 40   ;;  %s144_s14 = smov 32   ;;  %v115_v13 = vld [vmem:[%s209_s0 + $0x3] sm:$0x1]   ;;  %v116_v14 = vld [vmem:[%s209_s0 + $0x2] sm:$0x1]  }
   0x8   :  { %s145_s19 = smov 24   ;;  %s146_s20 = smov 16   ;;  %v117_v15 = vld [vmem:[%s209_s0 + $0x1] sm:$0x1]   ;;  %vm27_vm4 = vcmask 851712   ;;  %vm33_vm5 = vcmask 786112  }
   0x9   :  { %s147_s0 = smov 8   ;;  %vm39_vm6 = vcmask 720512   ;;  %vm45_vm7 = vcmask 654912   ;;  %vm51_vm8 = vcmask 589312   ;;  %vm57_vm9 = vcmask 523712  }
   0xa   :  { %31 = vrot.lane.b32.xlu0 %v107_v4, %s137_s24  ;;  %37 = vrot.lane.b32.xlu1 %v108_v5, %s138_s25  ;;  %vm63_vm10 = vcmask 458112   ;;  %vm69_vm11 = vcmask 392512   ;;  %vm75_vm12 = vcmask 326912   ;;  %vm81_vm13 = vcmask 261312  }
   0xb   :  { %vm87_vm14 = vcmask 195712   ;;  %vm93_vm15 = vcmask 130112  }
   0xe   :  { %43 = vrot.lane.b32.xlu0 %v109_v7, %s139_s30  ;;  %49 = vrot.lane.b32.xlu1 %v110_v8, %s140_s2 }
  0x12   :  { %55 = vrot.lane.b32.xlu0 %v111_v9, %s141_s7  ;;  %61 = vrot.lane.b32.xlu1 %v112_v10, %s142_s8 }
  0x16   :  { %67 = vrot.lane.b32.xlu0 %v113_v11, %s143_s13  ;;  %73 = vrot.lane.b32.xlu1 %v114_v12, %s144_s14 }
  0x1a   :  { %79 = vrot.lane.b32.xlu0 %v115_v13, %s145_s19  ;;  %85 = vrot.lane.b32.xlu1 %v116_v14, %s146_s20 }
  0x1e   :  { %91 = vrot.lane.b32.xlu0 %v117_v15, %s147_s0 }
  0x74   :  { %v8_v16 = vpop.permute.xlu0 %7   ;;  %v20_v17 = vpop.permute.xlu1 %19  }
  0x75   :  { %10 = vst.msk [vmem:[#allocation0] sm:$0x1] %vm9_vm1, %v8_v16  }
  0x78   :  { %v14_v18 = vpop.permute.xlu0 %13   ;;  %v26_v19 = vpop.permute.xlu1 %25  }
  0x79   :  { %16 = vst.msk [vmem:[#allocation0] sm:$0x1] %vm15_vm2, %v14_v18  }
  0x7a   :  { %22 = vst.msk [vmem:[#allocation0] sm:$0x1] %vm21_vm3, %v20_v17  }
  0x7b   :  { %28 = vst.msk [vmem:[#allocation0] sm:$0x1] %vm27_vm4, %v26_v19  }
  0x7c   :  { %v32_v20 = vpop.permute.xlu0 %31   ;;  %v38_v21 = vpop.permute.xlu1 %37  }
  0x7d   :  { %34 = vst.msk [vmem:[#allocation0] sm:$0x1] %vm33_vm5, %v32_v20  }
  0x7e   :  { %40 = vst.msk [vmem:[#allocation0] sm:$0x1] %vm39_vm6, %v38_v21  }
  0x80   :  { %v44_v22 = vpop.permute.xlu0 %43   ;;  %v50_v23 = vpop.permute.xlu1 %49  }
  0x81   :  { %46 = vst.msk [vmem:[#allocation0] sm:$0x1] %vm45_vm7, %v44_v22  }
  0x82   :  { %52 = vst.msk [vmem:[#allocation0] sm:$0x1] %vm51_vm8, %v50_v23  }
  0x84   :  { %v56_v24 = vpop.permute.xlu0 %55   ;;  %v62_v25 = vpop.permute.xlu1 %61  }
  0x85   :  { %58 = vst.msk [vmem:[#allocation0] sm:$0x1] %vm57_vm9, %v56_v24  }
  0x86   :  { %64 = vst.msk [vmem:[#allocation0] sm:$0x1] %vm63_vm10, %v62_v25  }
  0x88   :  { %v68_v26 = vpop.permute.xlu0 %67   ;;  %v74_v27 = vpop.permute.xlu1 %73  }
  0x89   :  { %70 = vst.msk [vmem:[#allocation0] sm:$0x1] %vm69_vm11, %v68_v26  }
  0x8a   :  { %76 = vst.msk [vmem:[#allocation0] sm:$0x1] %vm75_vm12, %v74_v27  }
  0x8c   :  { %v80_v28 = vpop.permute.xlu0 %79   ;;  %v86_v29 = vpop.permute.xlu1 %85  }
  0x8d   :  { %82 = vst.msk [vmem:[#allocation0] sm:$0x1] %vm81_vm13, %v80_v28  }
  0x8e   :  { %88 = vst.msk [vmem:[#allocation0] sm:$0x1] %vm87_vm14, %v86_v29  }
  0x90   :  { %v92_v30 = vpop.permute.xlu0 %91  }
  0x91   :  { %94 = vst.msk [vmem:[#allocation0] sm:$0x1] %vm93_vm15, %v92_v30  }
  0x98   :  { %v99_v31 = vld [vmem:[#allocation0] sm:$0x1] }
  0x99   :  { %102 = vst [vmem:[%s210_s1] sm:$0x1] %v99_v31 }

// kernel: conv_block_2d.2
= control target key start
LH: loop header
LB: loop body
LE: loop exit
PB: predicated region body
PF: predicated region fallthrough
CT: control target
= control target key end

     0   :  { %s701_s12 = smov 0   ;;  %s768_s0 = inlined_call_operand.vmem [shape: bf16[2,18,64], index: 0, kind: input, shape index: {}]   ;;  %s769_s1 = inlined_call_operand.vmem [shape: bf16[3,64,128], index: 1, kind: input, shape index: {}]   ;;  %s770_s2 = inlined_call_operand.vmem [shape: f32[2,16,128], index: 2, kind: output, shape index: {0}]   ;;  %s771_s3 = inlined_call_operand.vmem [shape: f32[2,2,128], index: 3, kind: output, shape index: {1}]  }
   0x1 LB: > { %s550_s13 = sadd.s32 4294967295, %s677_s12   ;;  %p554_p0 = scmp.ge.s32.totalorder %s677_s12, 1  ;;  %s677_s12 = sphi %s701_s12, %s14_s12  }
   0x2   : > { %p140_p1 = scmp.lt.s32.totalorder %s677_s12, 3 }
   0x4   : > { %p141_p2 = pnand %p554_p0, %p140_p1 }
   0x5   : > { %p168_p3 = scmp.lt.s32.totalorder (!%p141_p2), %s550_s13, 1 }
   0x6   : > { %144 = sbr.rel (%p141_p2) target bundleno = 261 (0x105), region = 28 }
   0xb   : > { %v657_v0 = vld [vmem:[%s769_s1 + $0x38] sm:$0xff]   ;;  %v679_v1 = vmov 0.0   ;;  %v659_v3 = vld [vmem:[%s769_s1 + $0x30] sm:$0xff]   ;;  %vm680_vm0 = vmmov 0   ;;  %s773_s13 = smov (!%p168_p3, %s550_s13), 1  ;;  %v661_v5 = vld [vmem:[%s769_s1 + $0x28] sm:$0xff]  }
   0xc   : > { %610 = vmatprep.subr.bf16.mxu0 %v679_v1  ;;  %622 = vmatprep.subr.bf16.mxu1 %v679_v1  ;;  %v658_v2 = vld [vmem:[%s769_s1 + $0x18] sm:$0xff]   ;;  %v660_v4 = vld [vmem:[%s769_s1 + $0x10] sm:$0xff]   ;;  %s646_s24 = smul.u32 12, %s773_s13  ;;  %v662_v6 = vld [vmem:[%s769_s1 + $0x8] sm:$0xff]   ;;  %vm211_vm1 = vsmask.f32 7424 }
   0xd   : > { %611 = vmatpush3.bf16.msra.mxu0 %v657_v0  ;;  %618 = vmatprep.mubr.msk.bf16.mxu0 %vm680_vm0, %v679_v1  ;;  %v663_v7 = vld [vmem:[%s769_s1 + $0x20] sm:$0xff]   ;;  %vm248_vm2 = vcmask 523264   ;;  %v667_v17 = vld [vmem:[%s769_s1 + $0x58] sm:$0xff]   ;;  %v668_v19 = vld [vmem:[%s769_s1 + $0x50] sm:$0xff]   ;;  %vm369_vm3 = vcmask 1046528   ;;  %s594_s17 = sshll.u32 %s773_s13, 4 }
   0xe   : > { %623 = vmatpush3.bf16.msra.mxu1 %v658_v2  ;;  %612 = vmatprep.subr.bf16.mxu0 %v679_v1  ;;  %s172_s29 = scalar_lea.vmem %s768_s0, %s646_s24  ;;  %v664_v10 = vld [vmem:[%s769_s1] sm:$0xff]   ;;  %v669_v20 = vld [vmem:[%s769_s1 + $0x48] sm:$0xff]   ;;  %s177_s20 = scalar_lea.vmem %s770_s2, %s594_s17  ;;  %vm461_vm4 = vcmask 1040384  }
   0xf   : > { %624 = vmatprep.subr.bf16.mxu1 %v679_v1  ;;  %630 = vmatprep.mubr.msk.bf16.mxu1 %vm680_vm0, %v679_v1  ;;  %v665_v8 = vld [vmem:[%s172_s29] sm:$0xff]   ;;  %v666_v9 = vld [vmem:[%s172_s29 + $0x8] ss:$0 sps:$4 sm:$0x11]   ;;  %s558_s21 = sshll.u32 %s773_s13, 1 }
  0x10   : > { %v213_v11 = vshrl.u32 %v665_v8, 16  ;;  %v215_v12 = vshll.u32 %v665_v8, 16  ;;  %v220_v13 = vshll.u32 %v666_v9, 16  ;;  %v670_v21 = vld [vmem:[%s769_s1 + $0x40] sm:$0xff]   ;;  %v370_v22 = vrot.slane %v665_v8, 1  ;;  %s181_s24 = scalar_lea.vmem %s771_s3, %s558_s21 }
  0x11   : > { %613 = vmatpush3.bf16.msra.mxu0 %v659_v3  ;;  %v371_v23 = vrot.slane %v666_v9, 1 }
  0x12   : > { %625 = vmatpush3.bf16.msra.mxu1 %v660_v4  ;;  %614 = vmatprep.subr.bf16.mxu0 %v679_v1  ;;  %v217_v14 = vrot.slane %v215_v12, 1  ;;  %v222_v15 = vrot.slane %v220_v13, 1 }
  0x13   : > { %626 = vmatprep.subr.bf16.mxu1 %v679_v1  ;;  %v372_v24 = vsel %vm369_vm3, %v370_v22, %v371_v23 }
  0x14   : > { %v218_v16 = vor.u32 %v217_v14, %v213_v11 }
  0x15   : > { %615 = vmatpush3.bf16.msra.mxu0 %v661_v5 }
  0x16   : > { %627 = vmatpush3.bf16.msra.mxu1 %v662_v6  ;;  %616 = vmatprep.subr.bf16.mxu0 %v679_v1  ;;  %v223_v18 = vsel %vm211_vm1, %v218_v16, %v222_v15 }
  0x17   : > { %628 = vmatprep.subr.bf16.mxu1 %v679_v1 }
  0x19   : > { %617 = vmatpush3.bf16.msra.mxu0 %v663_v7 }
  0x1a   : > { %629 = vmatpush3.bf16.msra.mxu1 %v664_v10  ;;  %634 = vmatprep.subr.bf16.mxu0 %v679_v1 }
  0x1c   : > { %619 = vmatmul.mubr.msk.bf16.vlgmr.msra.gmra.mxu0 %vm248_vm2, %v223_v18 }
  0x1d   : > { %631 = vmatmul.mubr.msk.bf16.vlgmr.msra.gmra.mxu1 %vm248_vm2, %v665_v8  ;;  %635 = vmatpush3.bf16.msra.mxu0 %v667_v17 }
  0x1e   : > { %642 = vmatprep.mubr.msk.bf16.mxu0 %vm680_vm0, %v679_v1  ;;  %636 = vmatprep.subr.bf16.mxu0 %v679_v1 }
  0x21   : > { %637 = vmatpush3.bf16.msra.mxu0 %v668_v19 }
  0x22   : > { %638 = vmatprep.subr.bf16.mxu0 %v679_v1 }
  0x25   : > { %639 = vmatpush3.bf16.msra.mxu0 %v669_v20 }
  0x26   : > { %640 = vmatprep.subr.bf16.mxu0 %v679_v1 }
  0x29   : > { %641 = vmatpush3.bf16.msra.mxu0 %v670_v21 }
  0x2c   : > { %643 = vmatmul.mubr.msk.bf16.vlgmr.msra.gmra.mxu0 %vm248_vm2, %v372_v24 }
  0xdc   : > { %v286_v26 = vpop.f32.mrf.mxu0 }
  0xdd   : > { %v353_v25 = vpop.f32.mrf.mxu1 }
  0xde   : > { %v620_v28 = vpop.f32.mrf.mxu0  ;;  %v354_v33 = vadd.f32 %v353_v25, %v286_v26 }
  0xdf   : > { %v632_v27 = vpop.f32.mrf.mxu1 }
  0xe0   : > { %v289_v30 = vpop.f32.mrf.mxu0 }
  0xe1   : > { %v356_v29 = vpop.f32.mrf.mxu1 }
  0xe2   : > { %v621_v32 = vpop.f32.mrf.mxu0  ;;  %v357_v37 = vadd.f32 %v356_v29, %v289_v30 }
  0xe3   : > { %v633_v31 = vpop.f32.mrf.mxu1 }
  0xec   : > { %v434_v34 = vpop.f32.mrf.mxu0 }
  0xed   : > { %v441_v35 = vadd.f32 %v434_v34, %v354_v33 }
  0xee   : > { %v644_v36 = vpop.f32.mrf.mxu0 }
  0xef   : > { %443 = vst [vmem:[%s177_s20] sm:$0xff] %v441_v35  ;;  %v452_v41 = vmul.f32 %v441_v35, %v441_v35 }
  0xf0   : > { %v437_v38 = vpop.f32.mrf.mxu0 }
  0xf1   : > { %v442_v39 = vadd.f32 %v437_v38, %v357_v37 }
  0xf2   : > { %v645_v40 = vpop.f32.mrf.mxu0 }
  0xf3   : > { %444 = vst [vmem:[%s177_s20 + $0x8] sm:$0xff] %v442_v39  ;;  %v445_v42 = vadd.f32 %v442_v39, %v441_v35  ;;  %v453_v43 = vmul.f32 %v442_v39, %v442_v39 }
  0xf5   : > { %v446_v44 = vrot.slane %v445_v42, 4  ;;  %v454_v45 = vadd.f32 %v453_v43, %v452_v41 }
  0xf7   : > { %v447_v46 = vadd.f32 %v446_v44, %v445_v42  ;;  %v455_v47 = vrot.slane %v454_v45, 4 }
  0xf9   : > { %v448_v48 = vrot.slane %v447_v46, 2  ;;  %v456_v49 = vadd.f32 %v455_v47, %v454_v45 }
  0xfb   : > { %v449_v50 = vadd.f32 %v448_v48, %v447_v46  ;;  %v457_v51 = vrot.slane %v456_v49, 2 }
  0xfd   : > { %v450_v52 = vrot.slane %v449_v50, 1  ;;  %v458_v53 = vadd.f32 %v457_v51, %v456_v49 }
  0xff   : > { %v459_v54 = vrot.slane %v458_v53, 1  ;;  %v451_v55 = vadd.f32 %v450_v52, %v449_v50 }
 0x101   : > { %v460_v56 = vadd.f32 %v459_v54, %v458_v53 }
 0x103   : > { %v462_v57 = vsel %vm461_vm4, %v451_v55, %v460_v56 }
 0x104   : > { %463 = vst [vmem:[%s181_s24] sm:$0x3] %v462_v57 }
 0x105 PF: > { %s14_s12 = sadd.s32 1, %s677_s12  }
 0x106   : > { %p11_p4 = scmp.ge.s32.totalorder %s14_s12, 4  }
 0x108   :  { %13 = sbr.rel (!%p11_p4) target bundleno = 1 (0x1), region = 72 }

// kernel: conv_block_2d.3
= control target key start
LH: loop header
LB: loop body
LE: loop exit
PB: predicated region body
PF: predicated region fallthrough
CT: control target
= control target key end

     0   :  { %s305_s12 = smov 0   ;;  %s328_s0 = inlined_call_operand.vmem [shape: f32[2,16,128], index: 0, kind: input, shape index: {}]   ;;  %s329_s1 = inlined_call_operand.vmem [shape: f32[1,128], index: 1, kind: input, shape index: {}]   ;;  %s330_s2 = inlined_call_operand.vmem [shape: f32[1,128], index: 2, kind: input, shape index: {}]   ;;  %s331_s3 = inlined_call_operand.vmem [shape: f32[2,16,128], index: 3, kind: output, shape index: {}]  }
   0x1 LB: > { %s254_s13 = sadd.s32 4294967295, %s283_s12   ;;  %p258_p0 = scmp.ge.s32.totalorder %s283_s12, 1  ;;  %s283_s12 = sphi %s305_s12, %s13_s12  }
   0x2   : > { %p137_p1 = scmp.lt.s32.totalorder %s283_s12, 3 }
   0x4   : > { %p138_p2 = pnand %p258_p0, %p137_p1 }
   0x5   : > { %p161_p3 = scmp.lt.s32.totalorder (!%p138_p2), %s254_s13, 1 }
   0x6   : > { %141 = sbr.rel (%p138_p2) target bundleno = 23 (0x17), region = 32 }
   0xb   : > { %s333_s13 = smov (!%p161_p3, %s254_s13), 1  ;;  %v263_v0 = vld [vmem:[%s329_s1] ss:$0 sm:$0xff] }
   0xc   : > { %s267_s14 = sshll.u32 %s333_s13, 4  ;;  %v264_v3 = vld [vmem:[%s330_s2] ss:$0 sm:$0xff] }
   0xd   : > { %s165_s19 = scalar_lea.vmem %s328_s0, %s267_s14  ;;  %s170_s24 = scalar_lea.vmem %s331_s3, %s267_s14 }
   0xe   : > { %v171_v1 = vld [vmem:[%s165_s19] sm:$0xff]  ;;  %v172_v2 = vld [vmem:[%s165_s19 + $0x8] sm:$0xff] }
   0xf   : > { %v180_v4 = vmul.f32 %v263_v0, %v171_v1  ;;  %v181_v5 = vmul.f32 %v263_v0, %v172_v2 }
  0x11   : > { %v189_v6 = vadd.f32 %v264_v3, %v180_v4  ;;  %v190_v7 = vadd.f32 %v264_v3, %v181_v5 }
  0x13   : > { %vm191_vm0 = vcmp.ge.f32.partialorder %v189_v6, 0.0  ;;  %v193_v8 = vmul.f32 0.01, %v189_v6  ;;  %vm192_vm1 = vcmp.ge.f32.partialorder %v190_v7, 0.0  ;;  %v194_v9 = vmul.f32 0.01, %v190_v7 }
  0x15   : > { %v195_v10 = vsel %vm191_vm0, %v189_v6, %v193_v8  ;;  %v196_v11 = vsel %vm192_vm1, %v190_v7, %v194_v9 }
  0x16   : > { %197 = vst [vmem:[%s170_s24] sm:$0xff] %v195_v10  ;;  %198 = vst [vmem:[%s170_s24 + $0x8] sm:$0xff] %v196_v11 }
  0x17 PF: > { %s13_s12 = sadd.s32 1, %s283_s12  }
  0x18   : > { %p10_p4 = scmp.ge.s32.totalorder %s13_s12, 4  }
  0x1a   :  { %12 = sbr.rel (!%p10_p4) target bundleno = 1 (0x1), region = 62 }

</bundles_post_ra>
